<compile_context>
chip_gen: v5e
topology: v5e:2x2
jax: 0.10.0
libtpu: 0.0.40
codegen_flags: <defaults>
</compile_context>

<pallas_src>
import functools
import math

import numpy as np
import jax
import jax.numpy as jnp
from jax.experimental import pallas as pl
from jax.experimental.pallas import tpu as pltpu


def _build_pe_table(d_model: int, max_seq_len: int = 160) -> np.ndarray:
    """Vectorized replica of the (non-standard) PyTorch __init__ table.

    sin columns use exponent 2*i/d_model, cos columns use 2*(i+1)/d_model,
    and a trailing column is left zero when d_model is odd — exactly like the
    reference module's double loop.
    """
    pe = np.zeros((max_seq_len, d_model), dtype=np.float32)
    pos = np.arange(max_seq_len, dtype=np.float64)[:, None]          # (P, 1)
    i = np.arange(0, d_model - 1, 2, dtype=np.float64)[None, :]      # even idx
    pe[:, 0:d_model - 1:2] = np.sin(pos / 10000.0 ** (2.0 * i / d_model))
    pe[:, 1:d_model:2] = np.cos(pos / 10000.0 ** (2.0 * (i + 1.0) / d_model))
    return pe


def _largest_aligned_divisor(total: int, align: int, cap: int) -> int:
    """Largest divisor of `total` that is a multiple of `align` and <= cap.

    Falls back to `total` itself (a full-extent block is always legal) when no
    aligned divisor exists.
    """
    best = 0
    i = 1
    while i * i <= total:
        if total % i == 0:
            for d in (i, total // i):
                if d % align == 0 and d <= cap and d > best:
                    best = d
        i += 1
    return best if best > 0 else total


def _pos_enc_kernel(x_ref, pe_ref, o_ref, *, scale):
    # Shapes broadcast: path 1 -> x (1, tS, D) + pe (tS, D),
    #                   path 2 -> x (B, tC)   + pe (1, tC).
    o_ref[...] = (x_ref[...] * scale + pe_ref[...]).astype(o_ref.dtype)


def positional_encoder(x: jax.Array, pe_table: jax.Array,
                       *, vmem_budget_bytes: int = 8 * 1024 * 1024) -> jax.Array:
    """x: (B, S, D), pe_table: (max_seq_len, D). Returns (B, S, D) in x.dtype.

    vmem_budget_bytes bounds the per-step working set (double-buffered in/out
    + pe blocks), sized conservatively so it fits the default scoped VMEM on
    v5e/v6e/v7x without raising vmem_limit_bytes.
    """
    B, S, D = x.shape
    scale = math.sqrt(D)
    itemsize = x.dtype.itemsize
    pe = pe_table.astype(x.dtype)          # match x.dtype -> halves pe bytes for bf16
    kernel = functools.partial(_pos_enc_kernel, scale=scale)
    cost = pl.CostEstimate(
        flops=2 * B * S * D,
        transcendentals=0,
        bytes_accessed=(2 * B * S * D + S * D) * itemsize,
    )

    if D % 128 == 0:
        # ---- Path 1: D is already lane-dense. Tile the sequence axis; make
        # batch the innermost grid axis so the pe block index is unchanged
        # across consecutive steps (Pallas skips the DMA -> pe fetched once
        # per S-tile instead of B times).
        # Per-step VMEM ~ 6 * tS * D * itemsize (2x x, 2x out, 2x pe buffers).
        row_cap = max(1, vmem_budget_bytes // (6 * D * itemsize))
        tS = _largest_aligned_divisor(S, 8, row_cap)
        # If no sublane-aligned divisor exists, tS == S; slice the table so the
        # pe block equals its full array dims (always a legal block shape).
        pe_in = pe if tS % 8 == 0 else pe[:S, :]
        grid = (S // tS, B)
        return pl.pallas_call(
            kernel,
            out_shape=jax.ShapeDtypeStruct((B, S, D), x.dtype),
            grid_spec=pl.GridSpec(
                grid=grid,
                in_specs=[
                    pl.BlockSpec((1, tS, D), lambda s, b: (b, s, 0)),
                    # Full table passed through; the index_map selects the
                    # window (no wrapper-side slice/copy needed).
                    pl.BlockSpec((tS, D), lambda s, b: (s, 0)),
                ],
                out_specs=pl.BlockSpec((1, tS, D), lambda s, b: (b, s, 0)),
            ),
            compiler_params=pltpu.CompilerParams(
                dimension_semantics=("parallel", "parallel")),
            cost_estimate=cost,
        )(x, pe_in)

    # ---- Path 2: D is not a multiple of 128 (e.g. the test's D=32), so stores
    # on a (.., D) block would be masked sub-128-lane partial stores. Flatten
    # (S, D) into one lane axis of length S*D and tile it in 128-multiples;
    # pe (1, tC) broadcasts over the batch rows inside the kernel.
    L = S * D
    x2 = x.reshape(B, L)
    pe2 = pe[:S, :].reshape(1, L)   # flatten needs the contiguous first-S rows
    lane_cap = max(128, vmem_budget_bytes // ((4 * B + 2) * itemsize))
    tC = _largest_aligned_divisor(L, 128, lane_cap)
    grid = (L // tC,)
    out2 = pl.pallas_call(
        kernel,
        out_shape=jax.ShapeDtypeStruct((B, L), x.dtype),
        grid_spec=pl.GridSpec(
            grid=grid,
            in_specs=[
                pl.BlockSpec((B, tC), lambda c: (0, c)),
                pl.BlockSpec((1, tC), lambda c: (0, c)),
            ],
            out_specs=pl.BlockSpec((B, tC), lambda c: (0, c)),
        ),
        compiler_params=pltpu.CompilerParams(
            dimension_semantics=("parallel",)),
        cost_estimate=cost,
    )(x2, pe2)
    return out2.reshape(B, S, D)


if __name__ == "__main__":
    MAX_SEQ_LEN = 160
    key = jax.random.PRNGKey(0)

    # Case 1: module-like small shape (exercises the lane-flattened path, D=32).
    B, S, D = 2, 8, 32
    x = jax.random.normal(key, (B, S, D), dtype=jnp.float32)
    pe_table = jnp.asarray(_build_pe_table(D, MAX_SEQ_LEN))
    out = jax.block_until_ready(positional_encoder(x, pe_table))
    ref = x * math.sqrt(D) + pe_table[None, :S, :]
    np.testing.assert_allclose(np.asarray(out), np.asarray(ref),
                               rtol=1e-6, atol=1e-6)

    # Case 2: lane-dense d_model (exercises the S-tiled, batch-innermost path).
    B2, S2, D2 = 2, 16, 128
    x2 = jax.random.normal(jax.random.PRNGKey(0), (B2, S2, D2), dtype=jnp.float32)
    pe_table2 = jnp.asarray(_build_pe_table(D2, MAX_SEQ_LEN))
    out2 = jax.block_until_ready(positional_encoder(x2, pe_table2))
    ref2 = x2 * math.sqrt(D2) + pe_table2[None, :S2, :]
    np.testing.assert_allclose(np.asarray(out2), np.asarray(ref2),
                               rtol=1e-6, atol=1e-6)

    print("KERNEL_OK")
</pallas_src>

<mosaic_0001>
module attributes {stable_mosaic.version = 11 : i64} {
  func.func @_pos_enc_kernel(%arg0: i32, %arg1: memref<2x256xf32, #tpu.memory_space<vmem>>, %arg2: memref<1x256xf32, #tpu.memory_space<vmem>>, %arg3: memref<2x256xf32, #tpu.memory_space<vmem>>) attributes {dimension_semantics = [#tpu.dimension_semantics<parallel>], iteration_bounds = array<i64: 1>, scalar_prefetch = 0 : i64, scratch_operands = 0 : i64, tpu.core_type = #tpu.core_type<tc>, window_params = [{transform_indices = @transform_0, window_bounds = array<i64: 2, 256>}, {transform_indices = @transform_1, window_bounds = array<i64: 1, 256>}, {transform_indices = @transform_2, window_bounds = array<i64: 2, 256>}]} {
    %c0 = arith.constant 0 : index
    %c0_0 = arith.constant 0 : index
    %0 = vector.load %arg1[%c0, %c0_0] : memref<2x256xf32, #tpu.memory_space<vmem>>, vector<2x256xf32>
    %cst = arith.constant 5.65685415 : f32
    %1 = vector.broadcast %cst : f32 to vector<2x256xf32>
    %2 = arith.mulf %0, %1 : vector<2x256xf32>
    %c0_1 = arith.constant 0 : index
    %c0_2 = arith.constant 0 : index
    %3 = vector.load %arg2[%c0_1, %c0_2] : memref<1x256xf32, #tpu.memory_space<vmem>>, vector<1x256xf32>
    %4 = vector.broadcast %3 : vector<1x256xf32> to vector<2x256xf32>
    %5 = arith.addf %2, %4 : vector<2x256xf32>
    %c0_3 = arith.constant 0 : index
    %c0_4 = arith.constant 0 : index
    %6 = vector.load %arg3[%c0_3, %c0_4] : memref<2x256xf32, #tpu.memory_space<vmem>>, vector<2x256xf32>
    tpu.vector_store %arg3[%c0_3, %c0_4], %5 {strides = array<i32>} : memref<2x256xf32, #tpu.memory_space<vmem>>, vector<2x256xf32>,
    return
  }
  func.func @transform_0(%arg0: i32) -> (i32, i32) {
    %c0_i32 = arith.constant 0 : i32
    %c0_i32_0 = arith.constant 0 : i32
    return %c0_i32, %arg0 : i32, i32
  }
  func.func @transform_1(%arg0: i32) -> (i32, i32) {
    %c0_i32 = arith.constant 0 : i32
    %c0_i32_0 = arith.constant 0 : i32
    return %c0_i32, %arg0 : i32, i32
  }
  func.func @transform_2(%arg0: i32) -> (i32, i32) {
    %c0_i32 = arith.constant 0 : i32
    %c0_i32_0 = arith.constant 0 : i32
    return %c0_i32, %arg0 : i32, i32
  }
}

</mosaic_0001>

<bundles_post_ra>
// kernel: tpu_custom_call.1
= control target key start
LH: loop header
LB: loop body
LE: loop exit
PB: predicated region body
PF: predicated region fallthrough
CT: control target
= control target key end

     0   :  { %7 = vsyncpa [#allocation3], 0  ;;  %s178_s0 = inlined_call_operand.hbm [shape: f32[2,256], index: 0, kind: input, shape index: {}]   ;;  %s179_s1 = inlined_call_operand.hbm [shape: f32[1,256], index: 1, kind: input, shape index: {}]   ;;  %s180_s2 = inlined_call_operand.hbm [shape: f32[2,256], index: 2, kind: output, shape index: {}]  }
   0x1   :  { %8 = vsyncpa [#allocation6], 0 }
   0x2   :  { %9 = vsyncpa [#allocation4], 0  ;;  %s15_s11 = sshll.u32 %s178_s0, 4  ;;  %s151_s12 = smov [#allocation2]   ;;  %s16_s11 = int_to_ptr.hbm [resolvable:$true] %s15_s11 }
   0x3   :  { %s17_s13 = sshll.u32 %s151_s12, 4  ;;  %s26_s16 = sshll.u32 %s179_s1, 4  ;;  %s18_s13 = int_to_ptr.vmem [resolvable:$true] %s17_s13  ;;  %s27_s16 = int_to_ptr.hbm [resolvable:$true] %s26_s16 }
   0x4   :  { %20 = dma.hbm_to_vmem [thread:$0]  %s16_s11, 64, %s18_s13, [#allocation3]  }
   0x5   :  { %s152_s17 = smov [#allocation5]  }
   0x6   :  { %s28_s18 = sshll.u32 %s152_s17, 4  ;;  %s29_s18 = int_to_ptr.vmem [resolvable:$true] %s28_s18 }
   0x7   :  { %31 = dma.hbm_to_vmem [thread:$0]  %s27_s16, 32, %s29_s18, [#allocation6]  }
   0x8   :  { %145 = dma.done.wait [#allocation3], 64  }
   0x9   :  { %146 = vsyncadd [#allocation3], 4294967232 }
   0xa   :  { %147 = dma.done.wait [#allocation6], 32  }
   0xb   :  { %148 = vsyncadd [#allocation6], 4294967264  ;;  %v40_v0 = vld [vmem:[#allocation2] sm:$0xf]  ;;  %v42_v1 = vld [vmem:[#allocation5] sm:$0x3] }
   0xc   :  { %v44_v2 = vperm.slane %v42_v1, 0  ;;  %v45_v3 = vperm.slane %v42_v1, 1  ;;  %v41_v4 = vmul.f32 5.656854, %v40_v0  ;;  %vm47_vm0 = vcmask 1041408   ;;  %s153_s0 = smov [#allocation7]  }
   0xd   :  { %s57_s19 = sshll.u32 %s153_s0, 4  ;;  %s59_s21 = sshll.u32 %s180_s2, 4  ;;  %s58_s19 = int_to_ptr.vmem [resolvable:$true] %s57_s19  ;;  %s60_s21 = int_to_ptr.hbm [resolvable:$true] %s59_s21 }
   0xe   :  { %v46_v5 = vrot.slane %v45_v3, 6 }
  0x10   :  { %v48_v6 = vsel %vm47_vm0, %v44_v2, %v46_v5 }
  0x11   :  { %v50_v7 = vadd.f32 %v48_v6, %v41_v4 }
  0x13   :  { %51 = vst [vmem:[#allocation7] sm:$0xf] %v50_v7 }
  0x14   :  { %62 = dma.vmem_to_hbm [thread:$0]  %s58_s19, 64, %s60_s21, [#allocation4]  }
  0x15   :  { %149 = dma.done.wait [#allocation4], 64  }
  0x16   :  { %150 = vsyncadd [#allocation4], 4294967232 }
  0x17   :  { %67 = vsyncpa [#allocation3], 1 }
  0x18   :  { %68 = vsyncpa [#allocation6], 1 }
  0x19   :  { %69 = vsyncpa [#allocation4], 1 }

</bundles_post_ra>
